<compile_context>
chip_gen: v6e
topology: v6e:2x2x1
jax: 0.10.0
libtpu: 0.0.40
codegen_flags: <defaults>
</compile_context>

<pallas_src>
import functools

import numpy as np
import jax
import jax.numpy as jnp
from jax.experimental import pallas as pl
from jax.experimental.pallas import tpu as pltpu

# ----------------------------- configuration ---------------------------------
CFG = dict(seq_len=16, pred_len=8, week_t=4, enc_in=4, patch_len=4,
           d_model=32, out_channel=8, cnn_kernel=3, pooling_size=2,
           conv=1, dropout=0.0)
Y_MARK_FEATS = 4
BN_EPS = 1e-5
LANES = 128
HALF = LANES // 2


def derived(cfg):
    L, K, p = cfg['seq_len'], cfg['cnn_kernel'], cfg['pooling_size']
    Lcnn = L - K + 1                         # Conv1d 'valid' output length
    Lp = Lcnn // p                           # MaxPool1d output length
    N = L // cfg['patch_len']                # input patches
    M = cfg['pred_len'] // cfg['patch_len']  # output patches
    return Lcnn, Lp, N, M


def _rup(n, m):
    return ((n + m - 1) // m) * m


def make_layout(cfg):
    """Static row offsets inside the two packed parameter buffers."""
    L, C, d = cfg['seq_len'], cfg['enc_in'], cfg['d_model']
    O = cfg['out_channel']
    _, Lp, N, M = derived(cfg)
    assert cfg['conv'] == 1
    assert cfg['pooling_size'] == 2, "pool folding assumes pooling_size == 2"
    assert O * Lp <= HALF and N * d <= LANES and L * C <= LANES and d % 2 == 0
    # bf16 weight buffer (matmul RHS only).  Every entry starts on a 16-row
    # boundary so all static ref slices are bf16-tile aligned.
    T = 0
    WF = T + _rup(L * C, 16)
    BD = WF + _rup(HALF, 16)
    SQ = BD + LANES
    wrows = SQ + _rup(d, 16)
    lay = dict(T=T, WF=WF, BD=BD, SQ=SQ, wrows=wrows,
               # f32 vector buffer rows
               ROW_CONVB=0, ROW_BF=1, ROW_ENCB=2, ROW_DECB=3, ROW_REB=4,
               ROW_CH=5, ROW_MONTH=8)
    lay['vrows'] = _rup(lay['ROW_MONTH'] + 12 * M, 8)
    return lay


# ------------------------------ Pallas kernel ---------------------------------
def _seg_rnn_kernel(x_ref, midx_ref, wbuf_ref, vbuf_ref, out_ref, *, cfg):
    _, Lp, N, M = derived(cfg)
    L, C, d, W = cfg['seq_len'], cfg['enc_in'], cfg['d_model'], cfg['patch_len']
    lay = make_layout(cfg)
    f32, bf16 = jnp.float32, jnp.bfloat16

    def vrow(r):                                  # [1,128] f32 bias/embedding row
        return vbuf_ref[r:r + 1, :]

    # ---- Conv1d + BatchNorm(eval) + ReLU as ONE block-Toeplitz matmul --------
    # column layout: even conv-time steps -> lanes o*Lp + j,
    #                odd  conv-time steps -> lanes HALF + o*Lp + j
    T = wbuf_ref[lay['T']:lay['T'] + L * C, :]                       # [L*C,128] bf16
    conv = jnp.dot(x_ref[...].astype(bf16), T, preferred_element_type=f32)
    conv = jnp.maximum(conv + vrow(lay['ROW_CONVB']), 0.0)           # [B,128]
    # MaxPool1d(2): one VPU max of the two lane halves (no reshapes).
    pooled = jnp.maximum(conv[:, :HALF], conv[:, HALF:])             # [B,64]

    # ---- linear_patch_cnn ∘ segment ∘ linear_patch (fused at pack time) ------
    Wf = wbuf_ref[lay['WF']:lay['WF'] + HALF, :]                     # [64,128]
    enc_x = jnp.dot(pooled.astype(bf16), Wf, preferred_element_type=f32)
    enc_x = jnp.maximum(enc_x + vrow(lay['ROW_BF']), 0.0)            # [B, N*d]

    # ---- encoder RNN: all N input projections via block-diag W_ih ------------
    BD = wbuf_ref[lay['BD']:lay['BD'] + LANES, :]                    # [128,128]
    xin = (jnp.dot(enc_x.astype(bf16), BD, preferred_element_type=f32)
           + vrow(lay['ROW_ENCB']))                                  # [B, N*d]

    sq = wbuf_ref[lay['SQ']:lay['SQ'] + d, :]       # lane-packed square weights
    whh_e, wih_d = sq[:, 0:d], sq[:, d:2 * d]
    whh_d, re_w = sq[:, 2 * d:3 * d], sq[:, 3 * d:3 * d + W]

    h = jnp.tanh(xin[:, 0:d])                       # h0 == 0 -> no recurrent dot
    for t in range(1, N):                           # N small; statically unrolled
        h = jnp.tanh(xin[:, t * d:(t + 1) * d]
                     + jnp.dot(h.astype(bf16), whh_e, preferred_element_type=f32))

    # ---- decoder tokens: SMEM month indices -> dynamic row gather ------------
    rows = [vbuf_ref[pl.ds(lay['ROW_MONTH'] + midx_ref[m], 1), :] for m in range(M)]
    # month rows occupy lanes 0:d/2, channel row is pre-placed at lanes d/2:d.
    tok = (jnp.concatenate(rows, axis=0) + vrow(lay['ROW_CH']))[:, :d]     # [M,d]

    inp_proj = (jnp.dot(tok.astype(bf16), wih_d, preferred_element_type=f32)
                + vrow(lay['ROW_DECB'])[:, :d])                            # [M,d]
    hid_proj = jnp.dot(h.astype(bf16), whh_d, preferred_element_type=f32)  # [B,d]
    re_b = vrow(lay['ROW_REB'])[:, :W]

    # ---- 1-step decoder RNN + output head, written per output patch ----------
    for m in range(M):
        hm = jnp.tanh(hid_proj + inp_proj[m:m + 1, :])                     # [B,d]
        ym = jnp.dot(hm.astype(bf16), re_w, preferred_element_type=f32) + re_b
        out_ref[:, m * W:(m + 1) * W] = jnp.maximum(ym, 0.0)


def seg_rnn_forward(x, x_mark, y_mark, wbuf, vbuf, cfg):
    """JAX/Pallas equivalent of CustomEmbedingCNNSegRNN.forward (x_mark unused)."""
    del x_mark
    assert cfg['conv'] == 1
    B, L, C = x.shape
    _, _, _, M = derived(cfg)
    # (y_mark[..., 1][-1] * 12).long(); clip keeps an out-of-range index from
    # reading a neighbouring buffer row (torch would raise instead).
    month_idx = jnp.clip((y_mark[-1, :, 1] * 12.0).astype(jnp.int32), 0, 12 * M - 1)
    kern = functools.partial(_seg_rnn_kernel, cfg=cfg)
    return pl.pallas_call(
        kern,
        out_shape=jax.ShapeDtypeStruct((B, cfg['pred_len']), jnp.float32),
        # No grid: everything is tiny and whole-array VMEM-resident.
        in_specs=[pl.BlockSpec(memory_space=pltpu.MemorySpace.VMEM),   # x (flat)
                  pl.BlockSpec(memory_space=pltpu.MemorySpace.SMEM),   # month idx
                  pl.BlockSpec(memory_space=pltpu.MemorySpace.VMEM),   # bf16 weights
                  pl.BlockSpec(memory_space=pltpu.MemorySpace.VMEM)],  # f32 vectors
        out_specs=pl.BlockSpec(memory_space=pltpu.MemorySpace.VMEM),
        compiler_params=pltpu.CompilerParams(vmem_limit_bytes=8 << 20),
    )(x.reshape(B, L * C), month_idx, wbuf, vbuf)


# ------------------------------ parameters ------------------------------------
def make_params(key, cfg):
    """Parameters in torch-native layouts ([out,in] weights, conv [O,C,K], ...)."""
    L, C, K = cfg['seq_len'], cfg['enc_in'], cfg['cnn_kernel']
    O, W, d = cfg['out_channel'], cfg['patch_len'], cfg['d_model']
    _, Lp, N, M = derived(cfg)
    ks = jax.random.split(key, 22)

    def w(k, shape, s=0.1):
        return jax.random.normal(k, shape, jnp.float32) * s

    return dict(
        conv_w=w(ks[0], (O, C, K)), conv_b=w(ks[1], (O,)),
        bn_gamma=1.0 + w(ks[2], (O,), 0.05), bn_beta=w(ks[3], (O,)),
        bn_mean=w(ks[4], (O,)), bn_var=1.0 + jnp.abs(w(ks[5], (O,), 0.05)),
        cnnlin_w=w(ks[6], (L, O * Lp)), cnnlin_b=w(ks[7], (L,)),
        patch_w=w(ks[8], (d, W)), patch_b=w(ks[9], (d,)),
        enc_wih=w(ks[10], (d, d)), enc_whh=w(ks[11], (d, d)),
        enc_bih=w(ks[12], (d,)), enc_bhh=w(ks[13], (d,)),
        dec_wih=w(ks[14], (d, d)), dec_whh=w(ks[15], (d, d)),
        dec_bih=w(ks[16], (d,)), dec_bhh=w(ks[17], (d,)),
        month_emb=w(ks[18], (12 * M, d // 2), 0.5),
        channel_emb=w(ks[19], (1, d // 2), 0.5),
        re_w=w(ks[20], (W, d)), re_b=w(ks[21], (W,)),
    )


def pack_params(tp, cfg):
    """One-time repack of torch-layout params into:
         wbuf [wrows,128] bf16 : every matmul RHS (Toeplitz conv, fused
                                 cnnlin∘patch, block-diag enc W_ih, lane-packed
                                 enc_whh|dec_wih|dec_whh|re_w slab)
         vbuf [vrows,128] f32  : biases + month/channel embeddings.
       All layout glue (Conv1d permute, im2col, pool pairing, segmentation,
       weight transposes, BN / bias folding) happens here, never per call."""
    L, C, K = cfg['seq_len'], cfg['enc_in'], cfg['cnn_kernel']
    O, p, W, d = cfg['out_channel'], cfg['pooling_size'], cfg['patch_len'], cfg['d_model']
    _, Lp, N, M = derived(cfg)
    lay = make_layout(cfg)
    f64 = np.float64

    conv_w = np.asarray(tp['conv_w'], f64)                               # [O,C,K]
    scale = np.asarray(tp['bn_gamma'], f64) / np.sqrt(np.asarray(tp['bn_var'], f64) + BN_EPS)
    shift = np.asarray(tp['bn_beta'], f64) - np.asarray(tp['bn_mean'], f64) * scale
    cbias = np.asarray(tp['conv_b'], f64) * scale + shift                # fused conv+BN bias

    # (1) block-Toeplitz Conv1d weight, BN scale folded in; the two members of
    #     each MaxPool pair land in opposite 64-lane halves.
    T = np.zeros((L * C, LANES), f64)
    conv_bias_row = np.zeros((LANES,), f64)
    for t in range(Lp * p):                        # conv time steps the pool keeps
        col = (t % p) * HALF + np.arange(O) * Lp + t // p
        conv_bias_row[col] = cbias
        for k in range(K):
            for c in range(C):
                T[(t + k) * C + c, col] = conv_w[:, c, k] * scale

    # (2) linear_patch_cnn and linear_patch fused (no nonlinearity between them);
    #     patch weight laid out block-diagonally -> segmentation is free.
    W1 = np.asarray(tp['cnnlin_w'], f64).T                               # [O*Lp, L]
    BDp = np.zeros((L, N * d), f64)
    for n in range(N):
        BDp[n * W:(n + 1) * W, n * d:(n + 1) * d] = np.asarray(tp['patch_w'], f64).T
    Wfused = np.zeros((HALF, LANES), f64)
    Wfused[:O * Lp, :N * d] = W1 @ BDp
    bf_row = np.zeros((LANES,), f64)
    bf_row[:N * d] = (np.asarray(tp['cnnlin_b'], f64) @ BDp
                      + np.tile(np.asarray(tp['patch_b'], f64), N))

    # (3) encoder W_ih block-diagonal: all N step input projections = 1 matmul.
    encBD = np.zeros((LANES, LANES), f64)
    for n in range(N):
        encBD[n * d:(n + 1) * d, n * d:(n + 1) * d] = np.asarray(tp['enc_wih'], f64).T
    encb_row = np.zeros((LANES,), f64)
    encb_row[:N * d] = np.tile(np.asarray(tp['enc_bih'], f64)
                               + np.asarray(tp['enc_bhh'], f64), N)

    # (4) lane-dense square-weight slab: 4 matrices share the 128 lanes.
    sq = np.zeros((_rup(d, 16), LANES), f64)
    sq[:d, 0:d] = np.asarray(tp['enc_whh'], f64).T
    sq[:d, d:2 * d] = np.asarray(tp['dec_wih'], f64).T
    sq[:d, 2 * d:3 * d] = np.asarray(tp['dec_whh'], f64).T
    sq[:d, 3 * d:3 * d + W] = np.asarray(tp['re_w'], f64).T

    wbuf = np.zeros((lay['wrows'], LANES), np.float32)
    wbuf[lay['T']:lay['T'] + L * C] = T
    wbuf[lay['WF']:lay['WF'] + HALF] = Wfused
    wbuf[lay['BD']:lay['BD'] + LANES] = encBD
    wbuf[lay['SQ']:lay['SQ'] + sq.shape[0]] = sq

    vbuf = np.zeros((lay['vrows'], LANES), np.float32)
    vbuf[lay['ROW_CONVB']] = conv_bias_row
    vbuf[lay['ROW_BF']] = bf_row
    vbuf[lay['ROW_ENCB']] = encb_row
    vbuf[lay['ROW_DECB'], :d] = np.asarray(tp['dec_bih']) + np.asarray(tp['dec_bhh'])
    vbuf[lay['ROW_REB'], :W] = np.asarray(tp['re_b'])
    vbuf[lay['ROW_CH'], d // 2:d] = np.asarray(tp['channel_emb']).reshape(-1)
    vbuf[lay['ROW_MONTH']:lay['ROW_MONTH'] + 12 * M, :d // 2] = np.asarray(tp['month_emb'])
    return jnp.asarray(wbuf, dtype=jnp.bfloat16), jnp.asarray(vbuf, dtype=jnp.float32)


# ------------------------------ pure-JAX reference ----------------------------
def reference_forward(x, x_mark, y_mark, tp, cfg):
    """Literal translation of the torch forward (conv==1, eval mode), f32."""
    del x_mark
    B, L, C = x.shape
    Lcnn, Lp, N, M = derived(cfg)
    K, O, p = cfg['cnn_kernel'], cfg['out_channel'], cfg['pooling_size']
    W, d = cfg['patch_len'], cfg['d_model']

    xc = jnp.transpose(x, (0, 2, 1))                              # [B, C, L]
    y = jnp.zeros((B, O, Lcnn), jnp.float32)
    for k in range(K):                                            # Conv1d, valid
        y = y + jnp.einsum('bcl,oc->bol', xc[:, :, k:k + Lcnn], tp['conv_w'][:, :, k])
    y = y + tp['conv_b'][None, :, None]
    y = (y - tp['bn_mean'][None, :, None]) / jnp.sqrt(tp['bn_var'][None, :, None] + BN_EPS)
    y = y * tp['bn_gamma'][None, :, None] + tp['bn_beta'][None, :, None]
    y = jnp.maximum(y, 0.0)
    y = y[:, :, :Lp * p].reshape(B, O, Lp, p).max(axis=-1)        # MaxPool1d
    cnn_out = y.reshape(B, O * Lp) @ tp['cnnlin_w'].T + tp['cnnlin_b']

    seg_w = cnn_out.reshape(B, N, W)
    enc_in = jnp.maximum(seg_w @ tp['patch_w'].T + tp['patch_b'], 0.0)

    h = jnp.zeros((B, d), jnp.float32)
    for t in range(N):
        h = jnp.tanh(enc_in[:, t, :] @ tp['enc_wih'].T + tp['enc_bih']
                     + h @ tp['enc_whh'].T + tp['enc_bhh'])
    h0_dec = jnp.repeat(h, M, axis=0)                             # [B*M, d]

    month_idx = (y_mark[-1, :, 1] * 12.0).astype(jnp.int32)       # [M]
    month_rows = tp['month_emb'][month_idx]                       # [M, d//2]
    dec_tok = jnp.concatenate(
        [jnp.tile(month_rows[None], (B, 1, 1)),
         jnp.tile(tp['channel_emb'][None], (B, M, 1))], axis=-1)  # [B, M, d]
    dec_in = dec_tok.reshape(B * M, d)
    h_d = jnp.tanh(dec_in @ tp['dec_wih'].T + tp['dec_bih']
                   + h0_dec @ tp['dec_whh'].T + tp['dec_bhh'])
    yw = h_d @ tp['re_w'].T + tp['re_b']
    return jnp.maximum(yw.reshape(B, M * W), 0.0)


# ----------------------------------- main --------------------------------------
if __name__ == "__main__":
    cfg = CFG
    B = 2
    _, _, _, M = derived(cfg)
    key = jax.random.PRNGKey(0)
    kx, kxm, kym, kp = jax.random.split(key, 4)

    x = jax.random.normal(kx, (B, cfg['seq_len'], cfg['enc_in']), jnp.float32)
    x_mark = jax.random.normal(kxm, (B, cfg['seq_len'], Y_MARK_FEATS), jnp.float32)
    # feature 1 of y_mark is the normalized month in [0, 1)
    y_mark = jax.random.uniform(kym, (B, M, Y_MARK_FEATS), jnp.float32)

    tp = make_params(kp, cfg)
    wbuf, vbuf = pack_params(tp, cfg)

    fwd = jax.jit(lambda a, b, c, wb, vb: seg_rnn_forward(a, b, c, wb, vb, cfg))
    out = jax.block_until_ready(fwd(x, x_mark, y_mark, wbuf, vbuf))

    assert out.shape == (B, cfg['pred_len']), out.shape
    assert bool(jnp.all(jnp.isfinite(out)))

    ref = reference_forward(x, x_mark, y_mark, tp, cfg)
    max_err = float(jnp.max(jnp.abs(out - ref)))
    assert bool(jnp.allclose(out, ref, atol=2e-2, rtol=2e-2)), (max_err, out, ref)

    print("KERNEL_OK")
</pallas_src>

<mosaic_0001>
module attributes {stable_mosaic.version = 11 : i64} {
  func.func @_seg_rnn_kernel(%arg0: memref<2x64xf32, #tpu.memory_space<vmem>>, %arg1: memref<2xi32, #tpu.memory_space<smem>>, %arg2: memref<288x128xbf16, #tpu.memory_space<vmem>>, %arg3: memref<32x128xf32, #tpu.memory_space<vmem>>, %arg4: memref<2x8xf32, #tpu.memory_space<vmem>>) attributes {dimension_semantics = [], scalar_prefetch = 0 : i64, scratch_operands = 0 : i64, tpu.core_type = #tpu.core_type<tc>} {
    %c0 = arith.constant 0 : index
    %c0_0 = arith.constant 0 : index
    %0 = vector.load %arg2[%c0, %c0_0] : memref<288x128xbf16, #tpu.memory_space<vmem>>, vector<64x128xbf16>
    %c0_1 = arith.constant 0 : index
    %c0_2 = arith.constant 0 : index
    %1 = vector.load %arg0[%c0_1, %c0_2] : memref<2x64xf32, #tpu.memory_space<vmem>>, vector<2x64xf32>
    %2 = arith.truncf %1 : vector<2x64xf32> to vector<2x64xbf16>
    %cst = arith.constant dense<0.000000e+00> : vector<2x128xf32>
    %3 = tpu.matmul %2, %0, %cst {dimension_numbers = #tpu.dot_dimension_numbers<[1], [0], [0], [1], [0, 0, 1, 1], [], []>} : vector<2x64xbf16>, vector<64x128xbf16>, vector<2x128xf32> -> vector<2x128xf32>
    %c0_3 = arith.constant 0 : index
    %c0_4 = arith.constant 0 : index
    %4 = vector.load %arg3[%c0_3, %c0_4] : memref<32x128xf32, #tpu.memory_space<vmem>>, vector<1x128xf32>
    %5 = vector.broadcast %4 : vector<1x128xf32> to vector<2x128xf32>
    %6 = arith.addf %3, %5 : vector<2x128xf32>
    %cst_5 = arith.constant 0.000000e+00 : f32
    %7 = vector.broadcast %cst_5 : f32 to vector<2x128xf32>
    %8 = arith.maximumf %6, %7 : vector<2x128xf32>
    %9 = vector.extract_strided_slice %8 {offsets = [0, 0], sizes = [2, 64], strides = [1, 1]} : vector<2x128xf32> to vector<2x64xf32>
    %10 = vector.extract_strided_slice %8 {offsets = [0, 64], sizes = [2, 64], strides = [1, 1]} : vector<2x128xf32> to vector<2x64xf32>
    %11 = arith.maximumf %9, %10 : vector<2x64xf32>
    %c64 = arith.constant 64 : index
    %c0_6 = arith.constant 0 : index
    %12 = vector.load %arg2[%c64, %c0_6] : memref<288x128xbf16, #tpu.memory_space<vmem>>, vector<64x128xbf16>
    %13 = arith.truncf %11 : vector<2x64xf32> to vector<2x64xbf16>
    %cst_7 = arith.constant dense<0.000000e+00> : vector<2x128xf32>
    %14 = tpu.matmul %13, %12, %cst_7 {dimension_numbers = #tpu.dot_dimension_numbers<[1], [0], [0], [1], [0, 0, 1, 1], [], []>} : vector<2x64xbf16>, vector<64x128xbf16>, vector<2x128xf32> -> vector<2x128xf32>
    %c1 = arith.constant 1 : index
    %c0_8 = arith.constant 0 : index
    %15 = vector.load %arg3[%c1, %c0_8] : memref<32x128xf32, #tpu.memory_space<vmem>>, vector<1x128xf32>
    %16 = vector.broadcast %15 : vector<1x128xf32> to vector<2x128xf32>
    %17 = arith.addf %14, %16 : vector<2x128xf32>
    %cst_9 = arith.constant 0.000000e+00 : f32
    %18 = vector.broadcast %cst_9 : f32 to vector<2x128xf32>
    %19 = arith.maximumf %17, %18 : vector<2x128xf32>
    %c128 = arith.constant 128 : index
    %c0_10 = arith.constant 0 : index
    %20 = vector.load %arg2[%c128, %c0_10] : memref<288x128xbf16, #tpu.memory_space<vmem>>, vector<128x128xbf16>
    %21 = arith.truncf %19 : vector<2x128xf32> to vector<2x128xbf16>
    %cst_11 = arith.constant dense<0.000000e+00> : vector<2x128xf32>
    %22 = tpu.matmul %21, %20, %cst_11 {dimension_numbers = #tpu.dot_dimension_numbers<[1], [0], [0], [1], [0, 0, 1, 1], [], []>} : vector<2x128xbf16>, vector<128x128xbf16>, vector<2x128xf32> -> vector<2x128xf32>
    %c2 = arith.constant 2 : index
    %c0_12 = arith.constant 0 : index
    %23 = vector.load %arg3[%c2, %c0_12] : memref<32x128xf32, #tpu.memory_space<vmem>>, vector<1x128xf32>
    %24 = vector.broadcast %23 : vector<1x128xf32> to vector<2x128xf32>
    %25 = arith.addf %22, %24 : vector<2x128xf32>
    %c256 = arith.constant 256 : index
    %c0_13 = arith.constant 0 : index
    %26 = vector.load %arg2[%c256, %c0_13] : memref<288x128xbf16, #tpu.memory_space<vmem>>, vector<32x128xbf16>
    %27 = vector.extract_strided_slice %26 {offsets = [0, 0], sizes = [32, 32], strides = [1, 1]} : vector<32x128xbf16> to vector<32x32xbf16>
    %28 = vector.extract_strided_slice %26 {offsets = [0, 32], sizes = [32, 32], strides = [1, 1]} : vector<32x128xbf16> to vector<32x32xbf16>
    %29 = vector.extract_strided_slice %26 {offsets = [0, 64], sizes = [32, 32], strides = [1, 1]} : vector<32x128xbf16> to vector<32x32xbf16>
    %30 = vector.extract_strided_slice %26 {offsets = [0, 96], sizes = [32, 4], strides = [1, 1]} : vector<32x128xbf16> to vector<32x4xbf16>
    %31 = vector.extract_strided_slice %25 {offsets = [0, 0], sizes = [2, 32], strides = [1, 1]} : vector<2x128xf32> to vector<2x32xf32>
    %32 = math.tanh %31 : vector<2x32xf32>
    %33 = vector.extract_strided_slice %25 {offsets = [0, 32], sizes = [2, 32], strides = [1, 1]} : vector<2x128xf32> to vector<2x32xf32>
    %34 = arith.truncf %32 : vector<2x32xf32> to vector<2x32xbf16>
    %cst_14 = arith.constant dense<0.000000e+00> : vector<2x32xf32>
    %35 = tpu.matmul %34, %27, %cst_14 {dimension_numbers = #tpu.dot_dimension_numbers<[1], [0], [0], [1], [0, 0, 1, 1], [], []>} : vector<2x32xbf16>, vector<32x32xbf16>, vector<2x32xf32> -> vector<2x32xf32>
    %36 = arith.addf %33, %35 : vector<2x32xf32>
    %37 = math.tanh %36 : vector<2x32xf32>
    %38 = vector.extract_strided_slice %25 {offsets = [0, 64], sizes = [2, 32], strides = [1, 1]} : vector<2x128xf32> to vector<2x32xf32>
    %39 = arith.truncf %37 : vector<2x32xf32> to vector<2x32xbf16>
    %cst_15 = arith.constant dense<0.000000e+00> : vector<2x32xf32>
    %40 = tpu.matmul %39, %27, %cst_15 {dimension_numbers = #tpu.dot_dimension_numbers<[1], [0], [0], [1], [0, 0, 1, 1], [], []>} : vector<2x32xbf16>, vector<32x32xbf16>, vector<2x32xf32> -> vector<2x32xf32>
    %41 = arith.addf %38, %40 : vector<2x32xf32>
    %42 = math.tanh %41 : vector<2x32xf32>
    %43 = vector.extract_strided_slice %25 {offsets = [0, 96], sizes = [2, 32], strides = [1, 1]} : vector<2x128xf32> to vector<2x32xf32>
    %44 = arith.truncf %42 : vector<2x32xf32> to vector<2x32xbf16>
    %cst_16 = arith.constant dense<0.000000e+00> : vector<2x32xf32>
    %45 = tpu.matmul %44, %27, %cst_16 {dimension_numbers = #tpu.dot_dimension_numbers<[1], [0], [0], [1], [0, 0, 1, 1], [], []>} : vector<2x32xbf16>, vector<32x32xbf16>, vector<2x32xf32> -> vector<2x32xf32>
    %46 = arith.addf %43, %45 : vector<2x32xf32>
    %47 = math.tanh %46 : vector<2x32xf32>
    %c0_17 = arith.constant 0 : index
    %48 = memref.load %arg1[%c0_17] : memref<2xi32, #tpu.memory_space<smem>>
    %c8_i32 = arith.constant 8 : i32
    %49 = arith.addi %c8_i32, %48 : i32
    %50 = arith.index_cast %49 : i32 to index
    %c0_18 = arith.constant 0 : index
    %51 = vector.load %arg3[%50, %c0_18] : memref<32x128xf32, #tpu.memory_space<vmem>>, vector<1x128xf32>
    %c1_19 = arith.constant 1 : index
    %52 = memref.load %arg1[%c1_19] : memref<2xi32, #tpu.memory_space<smem>>
    %c8_i32_20 = arith.constant 8 : i32
    %53 = arith.addi %c8_i32_20, %52 : i32
    %54 = arith.index_cast %53 : i32 to index
    %c0_21 = arith.constant 0 : index
    %55 = vector.load %arg3[%54, %c0_21] : memref<32x128xf32, #tpu.memory_space<vmem>>, vector<1x128xf32>
    %56 = tpu.concatenate %51, %55 in 0 : vector<1x128xf32>, vector<1x128xf32> -> vector<2x128xf32>
    %c5 = arith.constant 5 : index
    %c0_22 = arith.constant 0 : index
    %57 = vector.load %arg3[%c5, %c0_22] : memref<32x128xf32, #tpu.memory_space<vmem>>, vector<1x128xf32>
    %58 = vector.broadcast %57 : vector<1x128xf32> to vector<2x128xf32>
    %59 = arith.addf %56, %58 : vector<2x128xf32>
    %60 = vector.extract_strided_slice %59 {offsets = [0, 0], sizes = [2, 32], strides = [1, 1]} : vector<2x128xf32> to vector<2x32xf32>
    %61 = arith.truncf %60 : vector<2x32xf32> to vector<2x32xbf16>
    %cst_23 = arith.constant dense<0.000000e+00> : vector<2x32xf32>
    %62 = tpu.matmul %61, %28, %cst_23 {dimension_numbers = #tpu.dot_dimension_numbers<[1], [0], [0], [1], [0, 0, 1, 1], [], []>} : vector<2x32xbf16>, vector<32x32xbf16>, vector<2x32xf32> -> vector<2x32xf32>
    %c3 = arith.constant 3 : index
    %c0_24 = arith.constant 0 : index
    %63 = vector.load %arg3[%c3, %c0_24] : memref<32x128xf32, #tpu.memory_space<vmem>>, vector<1x128xf32>
    %64 = vector.extract_strided_slice %63 {offsets = [0, 0], sizes = [1, 32], strides = [1, 1]} : vector<1x128xf32> to vector<1x32xf32>
    %65 = vector.broadcast %64 : vector<1x32xf32> to vector<2x32xf32>
    %66 = arith.addf %62, %65 : vector<2x32xf32>
    %67 = arith.truncf %47 : vector<2x32xf32> to vector<2x32xbf16>
    %cst_25 = arith.constant dense<0.000000e+00> : vector<2x32xf32>
    %68 = tpu.matmul %67, %29, %cst_25 {dimension_numbers = #tpu.dot_dimension_numbers<[1], [0], [0], [1], [0, 0, 1, 1], [], []>} : vector<2x32xbf16>, vector<32x32xbf16>, vector<2x32xf32> -> vector<2x32xf32>
    %c4 = arith.constant 4 : index
    %c0_26 = arith.constant 0 : index
    %69 = vector.load %arg3[%c4, %c0_26] : memref<32x128xf32, #tpu.memory_space<vmem>>, vector<1x128xf32>
    %70 = vector.extract_strided_slice %69 {offsets = [0, 0], sizes = [1, 4], strides = [1, 1]} : vector<1x128xf32> to vector<1x4xf32>
    %71 = vector.extract_strided_slice %66 {offsets = [0, 0], sizes = [1, 32], strides = [1, 1]} : vector<2x32xf32> to vector<1x32xf32>
    %72 = vector.broadcast %71 : vector<1x32xf32> to vector<2x32xf32>
    %73 = arith.addf %68, %72 : vector<2x32xf32>
    %74 = math.tanh %73 : vector<2x32xf32>
    %75 = arith.truncf %74 : vector<2x32xf32> to vector<2x32xbf16>
    %cst_27 = arith.constant dense<0.000000e+00> : vector<2x4xf32>
    %76 = tpu.matmul %75, %30, %cst_27 {dimension_numbers = #tpu.dot_dimension_numbers<[1], [0], [0], [1], [0, 0, 1, 1], [], []>} : vector<2x32xbf16>, vector<32x4xbf16>, vector<2x4xf32> -> vector<2x4xf32>
    %77 = vector.broadcast %70 : vector<1x4xf32> to vector<2x4xf32>
    %78 = arith.addf %76, %77 : vector<2x4xf32>
    %cst_28 = arith.constant 0.000000e+00 : f32
    %79 = vector.broadcast %cst_28 : f32 to vector<2x4xf32>
    %80 = arith.maximumf %78, %79 : vector<2x4xf32>
    %c0_29 = arith.constant 0 : index
    %c0_30 = arith.constant 0 : index
    %81 = vector.load %arg4[%c0_29, %c0_30] : memref<2x8xf32, #tpu.memory_space<vmem>>, vector<2x4xf32>
    tpu.vector_store %arg4[%c0_29, %c0_30], %80 {strides = array<i32>} : memref<2x8xf32, #tpu.memory_space<vmem>>, vector<2x4xf32>,
    %82 = vector.extract_strided_slice %66 {offsets = [1, 0], sizes = [1, 32], strides = [1, 1]} : vector<2x32xf32> to vector<1x32xf32>
    %83 = vector.broadcast %82 : vector<1x32xf32> to vector<2x32xf32>
    %84 = arith.addf %68, %83 : vector<2x32xf32>
    %85 = math.tanh %84 : vector<2x32xf32>
    %86 = arith.truncf %85 : vector<2x32xf32> to vector<2x32xbf16>
    %cst_31 = arith.constant dense<0.000000e+00> : vector<2x4xf32>
    %87 = tpu.matmul %86, %30, %cst_31 {dimension_numbers = #tpu.dot_dimension_numbers<[1], [0], [0], [1], [0, 0, 1, 1], [], []>} : vector<2x32xbf16>, vector<32x4xbf16>, vector<2x4xf32> -> vector<2x4xf32>
    %88 = vector.broadcast %70 : vector<1x4xf32> to vector<2x4xf32>
    %89 = arith.addf %87, %88 : vector<2x4xf32>
    %cst_32 = arith.constant 0.000000e+00 : f32
    %90 = vector.broadcast %cst_32 : f32 to vector<2x4xf32>
    %91 = arith.maximumf %89, %90 : vector<2x4xf32>
    %c0_33 = arith.constant 0 : index
    %c4_34 = arith.constant 4 : index
    %92 = vector.load %arg4[%c0_33, %c4_34] : memref<2x8xf32, #tpu.memory_space<vmem>>, vector<2x4xf32>
    tpu.vector_store %arg4[%c0_33, %c4_34], %91 {strides = array<i32>} : memref<2x8xf32, #tpu.memory_space<vmem>>, vector<2x4xf32>,
    return
  }
}

</mosaic_0001>

<bundles_post_ra>
// kernel: _lambda_.1
= control target key start
LH: loop header
LB: loop body
LE: loop exit
PB: predicated region body
PF: predicated region fallthrough
CT: control target
= control target key end

     0   :  { %9 = vsyncpa [#allocation5], 0  ;;  %s1206_s0 = inlined_call_operand.vmem [shape: f32[2,64], index: 0, kind: input, shape index: {}]   ;;  %s1207_s1 = inlined_call_operand.vmem [shape: s32[2], index: 1, kind: input, shape index: {}]   ;;  %s1208_s2 = inlined_call_operand.hbm [shape: bf16[288,128], index: 2, kind: input, shape index: {}]   ;;  %s1209_s3 = inlined_call_operand.vmem [shape: f32[32,128], index: 3, kind: input, shape index: {}]   ;;  %s1210_s4 = inlined_call_operand.hbm [shape: f32[2,8], index: 4, kind: output, shape index: {}]  }
   0x1   :  { %10 = vsyncpa [#allocation3], 0 }
   0x2   :  { %11 = vsyncpa [#allocation4], 0  ;;  %s20_s17 = sshll.u32 %s1207_s1, 4  ;;  %s21_s17 = int_to_ptr.vmem [resolvable:$true] %s20_s17 }
   0x3   :  { %s984_s18 = scalar_lea.vmem %s21_s17, 16  ;;  %p989_p1 = scmp.lt.s32.totalorder %s21_s17, %s21_s17 }
   0x4   :  { %p985_p0 = scmp.ne.s32.totalorder %s21_s17, %s984_s18  ;;  %p990_p2 = scmp.lt.s32.totalorder %s984_s18, %s984_s18 }
   0x6   :  { %p991_p3 = por %p990_p2, %p989_p1 }
   0x8   :  { %p992_p4 = pnand %p991_p3, %p985_p0 }
   0xa   :  { %995 = shalt.err (!%p992_p4)
}
   0xb   :  { %s1042_s19 = smov [#allocation2]   ;;  %s1043_s20 = smov [#allocation6]  }
   0xc   :  { %23 = dma.vmem_to_smem %s21_s17, 16, %s1042_s19, [#allocation5]  }
   0xd   :  { %s29_s21 = sshll.u32 %s1043_s20, 4  ;;  %s30_s21 = int_to_ptr.vmem [resolvable:$true] %s29_s21 }
   0xe   :  { %s1004_s22 = scalar_lea.vmem %s30_s21, 2304  ;;  %p1009_p6 = scmp.lt.s32.totalorder %s30_s21, %s30_s21 }
   0xf   :  { %p1005_p5 = scmp.ne.s32.totalorder %s30_s21, %s1004_s22  ;;  %p1010_p7 = scmp.lt.s32.totalorder %s1004_s22, %s1004_s22 }
  0x11   :  { %p1011_p8 = por %p1010_p7, %p1009_p6 }
  0x13   :  { %p1012_p9 = pnand %p1011_p8, %p1005_p5 }
  0x15   :  { %1015 = shalt.err (!%p1012_p9)
}
  0x16   :  { %s1044_s1 = smov 64   ;;  %s1045_s23 = smov 4  }
  0x17   :  { %35 = dma.hbm_to_vmem [thread:$0]  %s1208_s2, 2304, %s30_s21, [#allocation3], %s1044_s1, %s1044_s1, %s1045_s23  }
  0x18   :  { %1036 = dma.done.wait [#allocation5], 16  }
  0x19   :  { %1037 = vsyncadd [#allocation5], 4294967280 }
  0x1a   :  { %1038 = dma.done.wait [#allocation3], 2304  }
  0x1b   :  { %1039 = vsyncadd [#allocation3], 4294964992 }
  0x1c   :  { %44 = sfence }
  0x1d   :  { %v954_v0 = vld [vmem:[#allocation6 + $0x18] sm:$0xff]   ;;  %v1046_v1 = vmov 0.0   ;;  %v955_v2 = vld [vmem:[#allocation6 + $0x10] sm:$0xff]   ;;  %vm1047_vm0 = vmmov 0   ;;  %v956_v3 = vld [vmem:[#allocation6 + $0x8] sm:$0xff]   ;;  %vm85_vm1 = vcmask 523264  }
  0x1e   :  { %845 = vmatprep.subr.bf16.mxu0 %v1046_v1  ;;  %857 = vmatprep.subr.bf16.mxu1 %v1046_v1  ;;  %v957_v4 = vld [vmem:[#allocation6] sm:$0xff]   ;;  %v958_v7 = vld [vmem:[#allocation6 + $0x38] sm:$0xff]   ;;  %v959_v8 = vld [vmem:[#allocation6 + $0x30] sm:$0xff]   ;;  %vm345_vm2 = vcmask 261120   ;;  %s1048_s6 = smov 32   ;;  %s1049_s7 = smov 96  }
  0x1f   :  { %846 = vmatpush3.bf16.msra.mxu0 %v954_v0  ;;  %853 = vmatprep.mubr.msk.bf16.mxu0 %vm1047_vm0, %v1046_v1  ;;  %v54_v5 = vld [vmem:[%s1206_s0] sm:$0x3]  ;;  %v960_v9 = vld [vmem:[#allocation6 + $0x28] sm:$0xff]   ;;  %v962_v11 = vld [vmem:[#allocation6 + $0x78] sm:$0xff]   ;;  %s796_s8 = sld [smem:[#allocation2 + $0x1]]  ;;  %vm512_vm3 = vcmask 1040384  }
  0x20   :  { %847 = vmatprep.subr.bf16.mxu0 %v1046_v1  ;;  %865 = vmatprep.mubr.msk.bf16.mxu1 %vm1047_vm0, %v1046_v1  ;;  %v55_v6 = vpack.c.bf16 %v54_v5, %v54_v5  ;;  %v961_v10 = vld [vmem:[#allocation6 + $0x20] sm:$0xff]   ;;  %v963_v13 = vld [vmem:[#allocation6 + $0x70] sm:$0xff]   ;;  %v964_v17 = vld [vmem:[#allocation6 + $0x68] sm:$0xff]   ;;  %s501_s9 = sld [smem:[#allocation2]]  ;;  %vm690_vm4 = vcmask 25600   ;;  %s1050_s22 = smov [#allocation7]  }
  0x21   :  { %858 = vmatpush3.bf16.msra.mxu1 %v958_v7  ;;  %v769_v12 = vld [vmem:[%s1209_s3] ss:$0 sm:$0xff]  ;;  %v966_v22 = vld [vmem:[#allocation6 + $0x58] sm:$0xff]   ;;  %v967_v23 = vld [vmem:[#allocation6 + $0x50] sm:$0xff]   ;;  %vm747_vm5 = vcmask 58400  }
  0x22   :  { %859 = vmatprep.subr.bf16.mxu1 %v1046_v1  ;;  %v965_v21 = vld [vmem:[#allocation6 + $0x60] sm:$0xff]   ;;  %v968_v27 = vld [vmem:[#allocation6 + $0x48] sm:$0xff]  }
  0x23   :  { %848 = vmatpush3.bf16.msra.mxu0 %v955_v2  ;;  %v969_v28 = vld [vmem:[#allocation6 + $0x40] sm:$0xff]   ;;  %v1125_v37 = vld [vmem:[#allocation6 + $0x88] sm:$0xff]  }
  0x24   :  { %849 = vmatprep.subr.bf16.mxu0 %v1046_v1  ;;  %v775_v29 = vld [vmem:[%s1209_s3 + $0x1] ss:$0 sm:$0xff]  ;;  %v781_v39 = vld [vmem:[%s1209_s3 + $0x2] ss:$0 sm:$0xff] }
  0x25   :  { %860 = vmatpush3.bf16.msra.mxu1 %v959_v8  ;;  %v1128_v38 = vld [vmem:[#allocation6 + $0x80] sm:$0xff]   ;;  %s767_s12 = scalar_lea.vmem %s1209_s3, %s796_s8 }
  0x26   :  { %861 = vmatprep.subr.bf16.mxu1 %v1046_v1  ;;  %v797_v8 = vld [vmem:[%s767_s12 + $0x8] sm:$0x1]  ;;  %s765_s15 = scalar_lea.vmem %s1209_s3, %s501_s9 }
  0x27   :  { %850 = vmatpush3.bf16.msra.mxu0 %v956_v3 }
  0x28   :  { %851 = vmatprep.subr.bf16.mxu0 %v1046_v1 }
  0x29   :  { %862 = vmatpush3.bf16.msra.mxu1 %v960_v9  ;;  %v510_v9 = vrot.slane %v797_v8, 7 }
  0x2a   :  { %863 = vmatprep.subr.bf16.mxu1 %v1046_v1 }
  0x2b   :  { %852 = vmatpush3.bf16.msra.mxu0 %v957_v4 }
  0x2c   :  { %869 = vmatprep.subr.bf16.mxu0 %v1046_v1 }
  0x2d   :  { %864 = vmatpush3.bf16.msra.mxu1 %v961_v10  ;;  %v795_v10 = vld [vmem:[%s765_s15 + $0x8] sm:$0x1] }
  0x2e   :  { %854 = vmatmul.mubr.msk.bf16.vlgmr.msra.gmra.mxu0 %vm85_vm1, %v55_v6  ;;  %889 = vmatprep.subr.bf16.mxu1 %v1046_v1 }
  0x2f   :  { %885 = vmatprep.mubr.msk.bf16.mxu0 %vm1047_vm0, %v1046_v1  ;;  %870 = vmatpush3.bf16.msra.mxu0 %v962_v11  ;;  %v513_v11 = vsel %vm512_vm3, %v795_v10, %v510_v9 }
  0x30   :  { %871 = vmatprep.subr.bf16.mxu0 %v1046_v1 }
  0x33   :  { %872 = vmatpush3.bf16.msra.mxu0 %v963_v13 }
  0x34   :  { %873 = vmatprep.subr.bf16.mxu0 %v1046_v1 }
  0x37   :  { %874 = vmatpush3.bf16.msra.mxu0 %v964_v17 }
  0x38   :  { %875 = vmatprep.subr.bf16.mxu0 %v1046_v1 }
  0x3b   :  { %876 = vmatpush3.bf16.msra.mxu0 %v965_v21 }
  0x3c   :  { %877 = vmatprep.subr.bf16.mxu0 %v1046_v1 }
  0x3f   :  { %878 = vmatpush3.bf16.msra.mxu0 %v966_v22 }
  0x40   :  { %879 = vmatprep.subr.bf16.mxu0 %v1046_v1 }
  0x43   :  { %880 = vmatpush3.bf16.msra.mxu0 %v967_v23 }
  0x44   :  { %881 = vmatprep.subr.bf16.mxu0 %v1046_v1 }
  0x47   :  { %882 = vmatpush3.bf16.msra.mxu0 %v968_v27 }
  0x48   :  { %883 = vmatprep.subr.bf16.mxu0 %v1046_v1 }
  0x4b   :  { %884 = vmatpush3.bf16.msra.mxu0 %v969_v28  ;;  %v629_v28 = vlaneseq }
  0x4c   :  { %921 = vmatprep.subr.bf16.mxu0 %v1046_v1 }
  0xee   :  { %v123_v14 = vpop.f32.mrf.mxu0 }
  0xef   :  { %v124_v15 = vadd.f32 %v769_v12, %v123_v14  ;;  %v798_v12 = vld [vmem:[%s1209_s3 + $0x5] ss:$0 sm:$0xff] }
  0xf0   :  { %v855_v16 = vpop.f32.mrf.mxu0  ;;  %v519_v14 = vadd.f32 %v798_v12, %v513_v11 }
  0xf1   :  { %v129_v18 = vmax.f32 %v124_v15, 0.0 }
  0xf2   :  { %v126_v19 = vpop.f32.mrf.mxu0  ;;  %v520_v17 = vpack.c.bf16 %v519_v14, %v519_v14 }
  0xf3   :  { %131 = vrot.lane.b32.xlu0 %v129_v18, %s1044_s1 }
  0xf4   :  { %v856_v20 = vpop.f32.mrf.mxu0 }
 0x165   :  { %v132_v24 = vpop.permute.xlu0 %131 }
 0x166   :  { %v134_v25 = vmax.f32 %v129_v18, %v132_v24 }
 0x168   :  { %v143_v26 = vpack.c.bf16 %v134_v25, %v134_v25 }
 0x16a   :  { %866 = vmatmul.mubr.msk.bf16.vlgmr.msra.gmra.mxu1 %vm85_vm1, %v143_v26 }
 0x16b   :  { %893 = vmatprep.mubr.msk.bf16.mxu1 %vm1047_vm0, %v1046_v1  ;;  %890 = vmatpush3.bf16.msra.mxu1 %v1125_v37 }
 0x16c   :  { %891 = vmatprep.subr.bf16.mxu1 %v1046_v1 }
 0x16f   :  { %892 = vmatpush3.bf16.msra.mxu1 %v1128_v38 }
 0x170   :  { %897 = vmatprep.subr.bf16.mxu1 %v1046_v1 }
 0x22a   :  { %v210_v30 = vpop.f32.mrf.mxu1 }
 0x22b   :  { %v211_v31 = vadd.f32 %v775_v29, %v210_v30  ;;  %v630_v29 = vshrl.u32 %v629_v28, 7  ;;  %v799_v30 = vld [vmem:[%s1209_s3 + $0x3] ss:$0 sm:$0xff] }
 0x22c   :  { %v867_v32 = vpop.f32.mrf.mxu1 }
 0x22d   :  { %v216_v33 = vmax.f32 %v211_v31, 0.0  ;;  %v631_v32 = vsub.s32 0, %v630_v29 }
 0x22e   :  { %v213_v34 = vpop.f32.mrf.mxu1 }
 0x22f   :  { %v233_v35 = vpack.c.bf16 %v216_v33, %v216_v33  ;;  %v694_v33 = vsub.s32 1, %v630_v29 }
 0x230   :  { %v868_v36 = vpop.f32.mrf.mxu1 }
 0x231   :  { %886 = vmatmul.mubr.bf16.vlgmr.msra.gmra.mxu0 %v233_v35 }
 0x232   :  { %925 = vmatprep.mubr.msk.bf16.mxu0 %vm1047_vm0, %v1046_v1 }
 0x2f1   :  { %v321_v40 = vpop.f32.mrf.mxu0 }
 0x2f2   :  { %v1136_v41 = vadd.f32 %v781_v39, %v321_v40 }
 0x2f3   :  { %v887_v42 = vpop.f32.mrf.mxu0 }
 0x2f4   :  { %972 = vtanh.f32 %v1136_v41 }
 0x2f5   :  { %v324_v43 = vpop.f32.mrf.mxu0 }
 0x2f7   :  { %v888_v44 = vpop.f32.mrf.mxu0 }
 0x301   :  { %v973_v45 = vpop.eup %972 }
 0x302   :  { %v332_v46 = vpack.c.bf16 %v973_v45, %v973_v45  ;;  %v802_v45 = vld [vmem:[%s1209_s3 + $0x4] ss:$0 sm:$0xff] }
 0x304   :  { %894 = vmatmul.mubr.msk.bf16.vlgmr.msra.gmra.mxu1 %vm345_vm2, %v332_v46 }
 0x305   :  { %898 = vmatpush3.bf16.msra.mxu1 %v1125_v37  ;;  %901 = vmatprep.mubr.msk.bf16.mxu1 %vm1047_vm0, %v1046_v1 }
 0x306   :  { %899 = vmatprep.subr.bf16.mxu1 %v1046_v1 }
 0x309   :  { %900 = vmatpush3.bf16.msra.mxu1 %v1128_v38 }
 0x30a   :  { %905 = vmatprep.subr.bf16.mxu1 %v1046_v1 }
 0x3c4   :  { %v383_v47 = vpop.f32.mrf.mxu1 }
 0x3c5   :  { %390 = vrot.lane.b32.xlu0 %v383_v47, %s1048_s6 }
 0x3c6   :  { %v895_v48 = vpop.f32.mrf.mxu1 }
 0x3c8   :  { %v386_v49 = vpop.f32.mrf.mxu1 }
 0x3ca   :  { %v896_v50 = vpop.f32.mrf.mxu1 }
 0x437   :  { %v391_v51 = vpop.permute.xlu0 %390 }
 0x438   :  { %v393_v52 = vadd.f32 %v391_v51, %v1136_v41 }
 0x43a   :  { %974 = vtanh.f32 %v393_v52 }
 0x447   :  { %v975_v53 = vpop.eup %974 }
 0x448   :  { %v395_v54 = vpack.c.bf16 %v975_v53, %v975_v53 }
 0x44a   :  { %397 = vrot.lane.b32.xlu1 %v395_v54, %s1049_s7 }
 0x4bc   :  { %v398_v55 = vpop.permute.xlu1 %397 }
 0x4bd   :  { %902 = vmatmul.mubr.msk.bf16.vlgmr.msra.gmra.mxu1 %vm345_vm2, %v398_v55 }
 0x4be   :  { %906 = vmatpush3.bf16.msra.mxu1 %v1125_v37  ;;  %909 = vmatprep.mubr.msk.bf16.mxu1 %vm1047_vm0, %v1046_v1 }
 0x4bf   :  { %907 = vmatprep.subr.bf16.mxu1 %v1046_v1 }
 0x4c2   :  { %908 = vmatpush3.bf16.msra.mxu1 %v1128_v38 }
 0x4c3   :  { %913 = vmatprep.subr.bf16.mxu1 %v1046_v1 }
 0x57d   :  { %v436_v56 = vpop.f32.mrf.mxu1 }
 0x57e   :  { %443 = vrot.lane.b32.xlu1 %v436_v56, %s1044_s1 }
 0x57f   :  { %v903_v57 = vpop.f32.mrf.mxu1 }
 0x581   :  { %v439_v58 = vpop.f32.mrf.mxu1 }
 0x583   :  { %v904_v59 = vpop.f32.mrf.mxu1 }
 0x5f0   :  { %v444_v60 = vpop.permute.xlu1 %443 }
 0x5f1   :  { %v446_v61 = vadd.f32 %v444_v60, %v1136_v41 }
 0x5f3   :  { %976 = vtanh.f32 %v446_v61 }
 0x600   :  { %v977_v62 = vpop.eup %976 }
 0x601   :  { %v448_v63 = vpack.c.bf16 %v977_v62, %v977_v62 }
 0x603   :  { %450 = vrot.lane.b32.xlu0 %v448_v63, %s1044_s1 }
 0x607   :  { %528 = vrot.lane.b32.xlu0 %v1125_v37, %s1049_s7 }
 0x60b   :  { %581 = vrot.lane.b32.xlu0 %v1125_v37, %s1044_s1 }
 0x675   :  { %v451_v0 = vpop.permute.xlu0 %450 }
 0x676   :  { %910 = vmatmul.mubr.msk.bf16.vlgmr.msra.gmra.mxu1 %vm345_vm2, %v451_v0 }
 0x677   :  { %917 = vmatprep.mubr.msk.bf16.mxu1 %vm1047_vm0, %v1046_v1 }
 0x679   :  { %v529_v6 = vpop.permute.xlu0 %528 }
 0x67a   :  { %914 = vmatpush3.bf16.msra.mxu1 %v529_v6 }
 0x67b   :  { %915 = vmatprep.subr.bf16.mxu1 %v1046_v1 }
 0x67d   :  { %v582_v7 = vpop.permute.xlu0 %581 }
 0x67e   :  { %922 = vmatpush3.bf16.msra.mxu0 %v582_v7 }
 0x67f   :  { %923 = vmatprep.subr.bf16.mxu0 %v1046_v1 }
 0x736   :  { %v489_v2 = vpop.f32.mrf.mxu1 }
 0x737   :  { %496 = vrot.lane.b32.xlu1 %v489_v2, %s1049_s7 }
 0x738   :  { %v911_v3 = vpop.f32.mrf.mxu1 }
 0x73a   :  { %v492_v4 = vpop.f32.mrf.mxu1 }
 0x73b   :  { %526 = vrot.lane.b32.xlu1 %v1128_v38, %s1049_s7 }
 0x73c   :  { %v912_v5 = vpop.f32.mrf.mxu1 }
 0x73f   :  { %579 = vrot.lane.b32.xlu1 %v1128_v38, %s1044_s1  ;;  %s755_s1 = sshll.u32 %s1050_s22, 4  ;;  %s756_s1 = int_to_ptr.vmem [resolvable:$true] %s755_s1 }
 0x740   :  { %s1016_s3 = scalar_lea.vmem %s756_s1, 32  ;;  %p1021_p11 = scmp.lt.s32.totalorder %s756_s1, %s756_s1 }
 0x741   :  { %p1017_p10 = scmp.ne.s32.totalorder %s756_s1, %s1016_s3  ;;  %p1022_p12 = scmp.lt.s32.totalorder %s1016_s3, %s1016_s3 }
 0x743   :  { %642 = vrot.lane.b32.xlu1 %v1125_v37, %s1048_s6  ;;  %p1023_p13 = por %p1022_p12, %p1021_p11 }
 0x745   :  { %p1024_p0 = pnand %p1023_p13, %p1017_p10 }
 0x7a9   :  { %v497_v13 = vpop.permute.xlu1 %496 }
 0x7aa   :  { %v499_v15 = vadd.f32 %v497_v13, %v1136_v41 }
 0x7ac   :  { %978 = vtanh.f32 %v499_v15 }
 0x7ad   :  { %v527_v16 = vpop.permute.xlu1 %526 }
 0x7ae   :  { %916 = vmatpush3.bf16.msra.mxu1 %v527_v16 }
 0x7af   :  { %929 = vmatprep.subr.bf16.mxu1 %v1046_v1 }
 0x7b1   :  { %918 = vmatmul.mubr.msk.bf16.vlgmr.msra.gmra.mxu1 %vm345_vm2, %v520_v17  ;;  %v580_v18 = vpop.permute.xlu1 %579 }
 0x7b2   :  { %924 = vmatpush3.bf16.msra.mxu0 %v580_v18  ;;  %933 = vmatprep.mubr.msk.bf16.mxu1 %vm1047_vm0, %v1046_v1 }
 0x7b3   :  { %937 = vmatprep.subr.bf16.mxu0 %v1046_v1 }
 0x7b5   :  { %v643_v26 = vpop.permute.xlu1 %642 }
 0x7b6   :  { %930 = vmatpush3.bf16.msra.mxu1 %v643_v26 }
 0x7b7   :  { %931 = vmatprep.subr.bf16.mxu1 %v1046_v1 }
 0x7b9   :  { %v979_v19 = vpop.eup %978 }
 0x7ba   :  { %v575_v20 = vpack.c.bf16 %v979_v19, %v979_v19 }
 0x7bc   :  { %577 = vrot.lane.b32.xlu0 %v575_v20, %s1048_s6 }
 0x7c0   :  { %640 = vrot.lane.b32.xlu0 %v1128_v38, %s1048_s6 }
 0x82e   :  { %v578_v21 = vpop.permute.xlu0 %577 }
 0x82f   :  { %926 = vmatmul.mubr.msk.bf16.vlgmr.msra.gmra.mxu0 %vm345_vm2, %v578_v21 }
 0x830   :  { %941 = vmatprep.mubr.msk.bf16.mxu0 %vm1047_vm0, %v1046_v1  ;;  %938 = vmatpush3.bf16.msra.mxu0 %v643_v26 }
 0x831   :  { %939 = vmatprep.subr.bf16.mxu0 %v1046_v1 }
 0x832   :  { %v641_v27 = vpop.permute.xlu0 %640 }
 0x833   :  { %932 = vmatpush3.bf16.msra.mxu1 %v641_v27 }
 0x834   :  { %940 = vmatpush3.bf16.msra.mxu0 %v641_v27 }
 0x871   :  { %v569_v22 = vpop.f32.mrf.mxu1 }
 0x872   :  { %v570_v31 = vadd.f32 %v799_v30, %v569_v22 }
 0x873   :  { %v919_v23 = vpop.f32.mrf.mxu1 }
 0x874   :  { %v632_v34 = vrot.slane %v570_v31, %v631_v32  ;;  %v695_v35 = vrot.slane %v570_v31, %v694_v33 }
 0x875   :  { %v572_v24 = vpop.f32.mrf.mxu1 }
 0x877   :  { %v920_v25 = vpop.f32.mrf.mxu1 }
 0x8ef   :  { %v622_v36 = vpop.f32.mrf.mxu0 }
 0x8f0   :  { %v633_v37 = vadd.f32 %v632_v34, %v622_v36  ;;  %v696_v38 = vadd.f32 %v695_v35, %v622_v36 }
 0x8f1   :  { %v927_v39 = vpop.f32.mrf.mxu0 }
 0x8f2   :  { %980 = vtanh.f32 %v633_v37 }
 0x8f3   :  { %982 = vtanh.f32 %v696_v38  ;;  %v625_v1 = vpop.f32.mrf.mxu0 }
 0x8f5   :  { %v928_v40 = vpop.f32.mrf.mxu0 }
 0x8ff   :  { %v981_v41 = vpop.eup %980 }
 0x900   :  { %v983_v42 = vpop.eup %982  ;;  %v635_v43 = vpack.c.bf16 %v981_v41, %v981_v41 }
 0x901   :  { %v698_v44 = vpack.c.bf16 %v983_v42, %v983_v42 }
 0x902   :  { %934 = vmatmul.mubr.msk.bf16.vlgmr.msra.gmra.mxu1 %vm345_vm2, %v635_v43 }
 0x903   :  { %942 = vmatmul.mubr.msk.bf16.vlgmr.msra.gmra.mxu0 %vm345_vm2, %v698_v44 }
 0x9c2   :  { %v683_v46 = vpop.f32.mrf.mxu1 }
 0x9c3   :  { %v684_v47 = vadd.f32 %v802_v45, %v683_v46  ;;  %v736_v48 = vpop.f32.mrf.mxu0 }
 0x9c4   :  { %v737_v49 = vadd.f32 %v802_v45, %v736_v48  ;;  %v935_v50 = vpop.f32.mrf.mxu1 }
 0x9c5   :  { %v689_v51 = vmax.f32 %v684_v47, 0.0  ;;  %v943_v52 = vpop.f32.mrf.mxu0 }
 0x9c6   :  { %v742_v53 = vmax.f32 %v737_v49, 0.0  ;;  %v686_v54 = vpop.f32.mrf.mxu1 }
 0x9c7   :  { %v739_v55 = vpop.f32.mrf.mxu0  ;;  %691 = vst.msk [vmem:[#allocation7] sm:$0x3] %vm690_vm4, %v689_v51 }
 0x9c8   :  { %744 = vrot.lane.b32.xlu1 %v742_v53, %s1045_s23  ;;  %v936_v56 = vpop.f32.mrf.mxu1 }
 0x9c9   :  { %v944_v57 = vpop.f32.mrf.mxu0 }
 0xa3a   :  { %v745_v58 = vpop.permute.xlu1 %744 }
 0xa3b   :  { %748 = vst.msk [vmem:[#allocation7] sm:$0x3] %vm747_vm5, %v745_v58 }
 0xa3c   :  { %1027 = shalt.err (!%p1024_p0)
}
 0xa3d   :  { %758 = dma.vmem_to_hbm [thread:$0]  %s756_s1, 32, %s1210_s4, [#allocation4]  }
 0xa3e   :  { %1040 = dma.done.wait [#allocation4], 32  }
 0xa3f   :  { %1041 = vsyncadd [#allocation4], 4294967264 }
 0xa40   :  { %762 = vsyncpa [#allocation3], 1 }
 0xa41   :  { %763 = vsyncpa [#allocation4], 1 }
 0xa42   :  { %764 = vsyncpa [#allocation5], 1 }

</bundles_post_ra>
